<compile_context>
chip_gen: v6e
topology: v6e:2x2x1
jax: 0.10.0
libtpu: 0.0.40
codegen_flags: <defaults>
</compile_context>

<pallas_src>
import math

import jax
import jax.numpy as jnp
from jax.experimental import pallas as pl
from jax.experimental.pallas import tpu as pltpu


# ----------------------------------------------------------------------------
# Kernel body: one (batch-block, time-tile) slab per grid step.
# ----------------------------------------------------------------------------
def _adaptive_scale_kernel(x_ref, scale_ref, cond_ref, o_ref):
    # x_ref     : VMEM (bb, tile_t, D)
    # scale_ref : VMEM (1, 1, D)                         -- resident every step
    # cond_ref  : VMEM (1|bb, 1|tile_t, D)               -- broadcasts in-kernel
    # o_ref     : VMEM (bb, tile_t, D)
    s = scale_ref[...] + cond_ref[...]
    o_ref[...] = (x_ref[...] * s).astype(o_ref.dtype)


def _sublane_multiple(dtype) -> int:
    # Packed sublane rows: f32 -> 8, bf16/f16 -> 16, int8/fp8 -> 32.
    return max(8, 32 // jnp.dtype(dtype).itemsize)


def _choose_tiles(B, T, D, itemsize, sub, budget_bytes):
    """Pick (batch_block, time_block) so one x slab stays ~under the budget,
    the time block respects the dtype's packed-sublane multiple (or is the
    full T extent), and the grid keeps >=2 blocks when shapes allow it so both
    v7x TensorCores are used."""
    rows = max(budget_bytes // max(D * itemsize, 1), 1)
    if rows < T:
        # Tile within T; one batch element per block.
        # NOTE: if D*itemsize is huge this minimum (sub rows) can exceed the
        # budget — covered by the explicit vmem_limit_bytes below.
        tile_t = max((rows // sub) * sub, sub)
        return 1, min(tile_t, T)
    # A full (T, D) slab fits the budget: group batch elements per block.
    bb = min(max(rows // T, 1), B)
    if bb >= B:
        if B >= 2:
            bb = max(B // 2, 1)                       # >= 2 batch blocks
        elif T >= 2 * sub:
            return 1, max(((T // 2) // sub) * sub, sub)  # >= 2 time blocks
    return bb, T


# ----------------------------------------------------------------------------
# Wrapper: out = x * (scale + cond), matching AdaptiveScaleEmbed.forward.
# ----------------------------------------------------------------------------
def adaptive_scale_embed(x: jax.Array, scale: jax.Array, cond: jax.Array,
                         *, budget_bytes: int = 4 << 20) -> jax.Array:
    B, T, D = x.shape
    assert scale.shape == (1, 1, D), scale.shape
    assert cond.ndim == 3 and cond.shape[-1] == D, cond.shape
    cb, ct, _ = cond.shape
    assert cb in (1, B) and ct in (1, T), cond.shape

    out_shape_orig = (B, T, D)

    # --- lane folding: make the last dim a multiple of 128 so output stores
    # are unmasked (lane-dense).  x / (ct==T) cond fold via a free contiguous
    # reshape; scale and (ct==1) cond are tiled k times (tiny (.,1,D) tensors).
    folded = False
    if D % 128 != 0:
        k = 128 // math.gcd(D, 128)
        if 1 < k <= T and T % k == 0:
            folded = True
            x = x.reshape(B, T // k, k * D)
            scale = jnp.tile(scale, (1, 1, k))
            if ct == 1:
                cond = jnp.tile(cond, (1, 1, k))
            else:
                cond = cond.reshape(cb, T // k, k * D)
            T, D = T // k, k * D
            ct = cond.shape[1]

    per_batch = cb != 1   # cond varies with batch
    per_time = ct != 1    # cond varies with time

    itemsize = jnp.dtype(x.dtype).itemsize
    sub = _sublane_multiple(x.dtype)
    bb, tile_t = _choose_tiles(B, T, D, itemsize, sub, budget_bytes)
    nb = pl.cdiv(B, bb)
    nt = pl.cdiv(T, tile_t)

    x_shape = (bb, tile_t, D)
    scale_shape = (1, 1, D)
    cond_shape = (bb if per_batch else 1, tile_t if per_time else 1, D)

    if per_time and not per_batch:
        # cond shared across batch but per-timestep: batch is the fastest grid
        # axis so the cond block index (0, t, 0) is constant across consecutive
        # steps and Pallas skips the re-DMA (cond read once per time tile).
        grid = (nt, nb)
        x_spec = pl.BlockSpec(x_shape, lambda t, b: (b, t, 0))
        scale_spec = pl.BlockSpec(scale_shape, lambda t, b: (0, 0, 0))
        cond_spec = pl.BlockSpec(cond_shape, lambda t, b: (0, t, 0))
        out_spec = pl.BlockSpec(x_shape, lambda t, b: (b, t, 0))
    else:
        grid = (nb, nt)
        x_spec = pl.BlockSpec(x_shape, lambda b, t: (b, t, 0))
        scale_spec = pl.BlockSpec(scale_shape, lambda b, t: (0, 0, 0))
        cond_spec = pl.BlockSpec(
            cond_shape,
            lambda b, t: (b if per_batch else 0, t if per_time else 0, 0),
        )
        out_spec = pl.BlockSpec(x_shape, lambda b, t: (b, t, 0))

    # True HBM footprint: x read + out write + cond read (un-broadcast) + scale.
    bytes_accessed = (
        2 * x.size * itemsize
        + cond.size * jnp.dtype(cond.dtype).itemsize
        + scale.size * jnp.dtype(scale.dtype).itemsize
    )
    cost = pl.CostEstimate(flops=2 * x.size, transcendentals=0,
                           bytes_accessed=bytes_accessed)

    out = pl.pallas_call(
        _adaptive_scale_kernel,
        out_shape=jax.ShapeDtypeStruct((B, T, D), x.dtype),
        grid_spec=pltpu.PrefetchScalarGridSpec(
            num_scalar_prefetch=0,
            grid=grid,
            in_specs=[x_spec, scale_spec, cond_spec],
            out_specs=out_spec,
        ),
        compiler_params=pltpu.CompilerParams(
            dimension_semantics=("parallel", "parallel"),
            # 3 slabs x 2 buffers x ~4 MiB ~= 24 MiB working set; explicit
            # limit so it also compiles under v5e's 16 MiB default scope and
            # stays within v7x's 64 MiB physical VMEM.
            vmem_limit_bytes=48 << 20,
        ),
        cost_estimate=cost,
    )(x, scale, cond)

    if folded:
        out = out.reshape(out_shape_orig)
    return out


# ----------------------------------------------------------------------------
# Pure-JAX reference for correctness checking.
# ----------------------------------------------------------------------------
def adaptive_scale_embed_ref(x, scale, cond):
    return x * (scale + cond)


if __name__ == "__main__":
    key = jax.random.PRNGKey(0)
    k_scale, k_x, k_c1, k_c2, k_c3 = jax.random.split(key, 5)

    # Small shapes consistent with the module: batch=2, seq=8, hidden=32.
    B, T, D = 2, 8, 32

    # nn.Parameter(torch.randn(1, 1, dim) / dim ** 0.5)
    scale = jax.random.normal(k_scale, (1, 1, D), dtype=jnp.float32) / (D ** 0.5)
    x = jax.random.normal(k_x, (B, T, D), dtype=jnp.float32)

    # Per-sequence conditioning (broadcast over time) — common pflow usage.
    cond = jax.random.normal(k_c1, (B, 1, D), dtype=jnp.float32)
    out = jax.block_until_ready(adaptive_scale_embed(x, scale, cond))
    ref = adaptive_scale_embed_ref(x, scale, cond)
    assert out.shape == (B, T, D), out.shape
    assert jnp.allclose(out, ref, atol=1e-6, rtol=1e-6), "mismatch (B,1,D) cond"

    # Per-timestep, per-batch conditioning.
    cond = jax.random.normal(k_c2, (B, T, D), dtype=jnp.float32)
    out = jax.block_until_ready(adaptive_scale_embed(x, scale, cond))
    ref = adaptive_scale_embed_ref(x, scale, cond)
    assert jnp.allclose(out, ref, atol=1e-6, rtol=1e-6), "mismatch (B,T,D) cond"

    # Per-timestep conditioning shared across batch — exercises the
    # batch-innermost grid ordering (cond block stays resident).
    cond = jax.random.normal(k_c3, (1, T, D), dtype=jnp.float32)
    out = jax.block_until_ready(adaptive_scale_embed(x, scale, cond))
    ref = adaptive_scale_embed_ref(x, scale, cond)
    assert jnp.allclose(out, ref, atol=1e-6, rtol=1e-6), "mismatch (1,T,D) cond"

    print("KERNEL_OK")
</pallas_src>

<mosaic_0001>
module attributes {stable_mosaic.version = 11 : i64} {
  func.func @_adaptive_scale_kernel(%arg0: i32, %arg1: i32, %arg2: memref<1x2x128xf32, #tpu.memory_space<vmem>>, %arg3: memref<1x1x128xf32, #tpu.memory_space<vmem>>, %arg4: memref<1x1x128xf32, #tpu.memory_space<vmem>>, %arg5: memref<1x2x128xf32, #tpu.memory_space<vmem>>) attributes {dimension_semantics = [#tpu.dimension_semantics<parallel>, #tpu.dimension_semantics<parallel>], iteration_bounds = array<i64: 2, 1>, scalar_prefetch = 0 : i64, scratch_operands = 0 : i64, tpu.core_type = #tpu.core_type<tc>, window_params = [{transform_indices = @transform_0, window_bounds = array<i64: 1, 2, 128>}, {pipeline_mode = #tpu.pipeline_mode<synchronous>, transform_indices = @transform_1, window_bounds = array<i64: 1, 1, 128>}, {transform_indices = @transform_2, window_bounds = array<i64: 1, 1, 128>}, {transform_indices = @transform_3, window_bounds = array<i64: 1, 2, 128>}]} {
    %c0 = arith.constant 0 : index
    %c0_0 = arith.constant 0 : index
    %c0_1 = arith.constant 0 : index
    %0 = vector.load %arg3[%c0, %c0_0, %c0_1] : memref<1x1x128xf32, #tpu.memory_space<vmem>>, vector<1x1x128xf32>
    %c0_2 = arith.constant 0 : index
    %c0_3 = arith.constant 0 : index
    %c0_4 = arith.constant 0 : index
    %1 = vector.load %arg4[%c0_2, %c0_3, %c0_4] : memref<1x1x128xf32, #tpu.memory_space<vmem>>, vector<1x1x128xf32>
    %2 = arith.addf %0, %1 : vector<1x1x128xf32>
    %c0_5 = arith.constant 0 : index
    %c0_6 = arith.constant 0 : index
    %c0_7 = arith.constant 0 : index
    %3 = vector.load %arg2[%c0_5, %c0_6, %c0_7] : memref<1x2x128xf32, #tpu.memory_space<vmem>>, vector<1x2x128xf32>
    %4 = vector.broadcast %2 : vector<1x1x128xf32> to vector<1x2x128xf32>
    %5 = arith.mulf %3, %4 : vector<1x2x128xf32>
    %c0_8 = arith.constant 0 : index
    %c0_9 = arith.constant 0 : index
    %c0_10 = arith.constant 0 : index
    %6 = vector.load %arg5[%c0_8, %c0_9, %c0_10] : memref<1x2x128xf32, #tpu.memory_space<vmem>>, vector<1x2x128xf32>
    tpu.vector_store %arg5[%c0_8, %c0_9, %c0_10], %5 {strides = array<i32>} : memref<1x2x128xf32, #tpu.memory_space<vmem>>, vector<1x2x128xf32>,
    return
  }
  func.func @transform_0(%arg0: i32, %arg1: i32) -> (i32, i32, i32) {
    %c0_i32 = arith.constant 0 : i32
    %c0_i32_0 = arith.constant 0 : i32
    return %arg0, %arg1, %c0_i32 : i32, i32, i32
  }
  func.func @transform_1(%arg0: i32, %arg1: i32) -> (i32, i32, i32) {
    %c0_i32 = arith.constant 0 : i32
    %c0_i32_0 = arith.constant 0 : i32
    %c0_i32_1 = arith.constant 0 : i32
    %c0_i32_2 = arith.constant 0 : i32
    return %c0_i32, %c0_i32_0, %c0_i32_1 : i32, i32, i32
  }
  func.func @transform_2(%arg0: i32, %arg1: i32) -> (i32, i32, i32) {
    %c0_i32 = arith.constant 0 : i32
    %c0_i32_0 = arith.constant 0 : i32
    %c0_i32_1 = arith.constant 0 : i32
    return %arg0, %c0_i32, %c0_i32_0 : i32, i32, i32
  }
  func.func @transform_3(%arg0: i32, %arg1: i32) -> (i32, i32, i32) {
    %c0_i32 = arith.constant 0 : i32
    %c0_i32_0 = arith.constant 0 : i32
    return %arg0, %arg1, %c0_i32 : i32, i32, i32
  }
}

</mosaic_0001>

<bundles_post_ra>
// kernel: tpu_custom_call.1
= control target key start
LH: loop header
LB: loop body
LE: loop exit
PB: predicated region body
PF: predicated region fallthrough
CT: control target
= control target key end

     0   :  { %8 = vsyncpa [#allocation3], 0  ;;  %s682_s0 = inlined_call_operand.hbm [shape: f32[2,2,128], index: 0, kind: input, shape index: {}]   ;;  %s683_s1 = inlined_call_operand.vmem [shape: f32[1,1,128], index: 1, kind: input, shape index: {}]   ;;  %s684_s2 = inlined_call_operand.vmem [shape: f32[2,1,128], index: 2, kind: input, shape index: {}]   ;;  %s685_s3 = inlined_call_operand.hbm [shape: f32[2,2,128], index: 3, kind: output, shape index: {}]  }
   0x1   :  { %10 = vsyncpa [#allocation3 + $0x1], 0 }
   0x2   :  { %11 = vsyncpa [#allocation4], 0 }
   0x3   :  { %13 = vsyncpa [#allocation4 + $0x1], 0  ;;  %s540_s12 = smov 0   ;;  %s542_s13 = smov 0  }
   0x4   :  { %s544_s14 = smov 0   ;;  %s546_s15 = smov 0  }
   0x5   :  { %s548_s16 = smov 0   ;;  %s550_s17 = smov 0  }
   0x6 LB: > { %s333_s18 = sadd.s32 4294967295, %s516_s17   ;;  %s334_s19 = sadd.s32 4294967294, %s516_s17   ;;  %s516_s17 = sphi %s550_s17, %s19_s17   ;;  %s512_s16 = sphi %s548_s16, %s697_s16   ;;  %s508_s15 = sphi %s546_s15, %s696_s15   ;;  %s504_s14 = sphi %s544_s14, %s695_s14   ;;  %s500_s13 = sphi %s542_s13, %s694_s13   ;;  %s496_s12 = sphi %s540_s12, %s693_s12  }
   0x7   : > { %s31_s20 = sadd.s32 1, %s512_s16  ;;  %s40_s21 = sadd.s32 1, %s504_s14 }
   0x8   : > { %p33_p0 = scmp.ge.s32.totalorder %s31_s20, 2  ;;  %p47_p1 = scmp.ne.s32.totalorder %s504_s14, %s500_s13 }
   0x9   : > { %p48_p2 = scmp.eq.s32.totalorder %s516_s17, 0  ;;  %p53_p3 = scmp.ne.s32.totalorder %s500_s13, %s496_s12 }
   0xa   : > { %s699_s20 = smov (%p33_p0, %s31_s20), 0  ;;  %p54_p5 = scmp.eq.s32.totalorder %s333_s18, 0 }
   0xb   : > { %p581_p4 = por %p48_p2, %p47_p1  ;;  %s35_s23 = ssub.s32 %s512_s16, %s699_s20 }
   0xc   : > { %p126_p6 = scmp.eq.s32.totalorder %s333_s18, 1  ;;  %p38_p7 = scmp.eq.s32.totalorder %s35_s23, 0 }
   0xd   : > { %p587_p8 = por %p54_p5, %p53_p3  ;;  %p132_p10 = scmp.eq.s32.totalorder %s334_s19, 1 }
   0xe   : > { %p591_p9 = por %p126_p6, %p47_p1  ;;  %p358_p13 = scmp.lt.s32.totalorder %s516_s17, 2 }
   0xf   : > { %s596_s26 = scalar_select %p38_p7, %s504_s14, %s40_s21  }
  0x10   : > { %p598_p11 = por %p132_p10, %p53_p3  ;;  %s155_s28 = sand.u32 1, %s504_s14  }
  0x11   : > { %s337_s29 = sshll.u32 %s155_s28, 1  ;;  %s338_s30 = sshll.u32 %s512_s16, 5 }
  0x12   : > { %s689_s27 = scalar_select %p598_p11, 1, 0 }
  0x13   : > { %s165_s6 = scalar_lea.hbm %s682_s0, %s338_s30  ;;  %s159_s7 = scalar_lea.vmem [#allocation2], %s337_s29 }
  0x14   : > { %s167_s8 = sshll.u32 %s159_s7, 4  ;;  %p611_p0 = pnand %p358_p13, %p581_p4  ;;  %s168_s8 = int_to_ptr.vmem [resolvable:$true] %s167_s8 }
  0x15   : > { %p339_p1 = scmp.ge.s32.totalorder %s516_s17, 1  ;;  %p178_p2 = scmp.lt.s32.totalorder %s516_s17, 3 }
  0x16   : > { %s156_s10 = scalar_lea.sflag [#allocation3], %s155_s28  ;;  %p410_p3 = pneg %p611_p0 }
  0x17   : > { %s421_s11 = scalar_lea.vmem %s168_s8, 32  ;;  %s518_s18 = smov [#allocation2]  }
  0x18   : > { %p422_p5 = scmp.ne.s32.totalorder %s168_s8, %s421_s11  ;;  %s426_s19 = sshll.u32 %s518_s18, 4  ;;  %s427_s19 = int_to_ptr.vmem [resolvable:$false] %s426_s19 }
  0x19   : > { %s428_s21 = scalar_lea.vmem %s427_s19, 64  ;;  %p429_p10 = scmp.lt.s32.totalorder %s168_s8, %s427_s19 }
  0x1a   : > { %p424_p6 = pnand %p422_p5, %p410_p3  ;;  %p430_p12 = scmp.lt.s32.totalorder %s428_s21, %s421_s11 }
  0x1c   : > { %p425_p7 = pneg %p424_p6  ;;  %p431_p4 = por %p430_p12, %p429_p10 }
  0x1e   : > { %p432_p13 = pnand %p431_p4, %p425_p7 }
  0x20   : > { %435 = shalt.err (!%p432_p13)
}
  0x21   : > { %353 = dma.hbm_to_vmem [thread:$0]  (!%p611_p0), %s165_s6, 32, %s168_s8, %s156_s10  }
  0x22   : > { %p179_p11 = pnand %p339_p1, %p178_p2 }
  0x23   : > { %s626_s22 = sand.u32 (!%p179_p11), 1, %s500_s13  }
  0x24   : > { %182 = sbr.rel (%p179_p11) target bundleno = 68 (0x44), region = 32  ;;  %s340_s23 = sshll.u32 (!%p179_p11), %s626_s22, 1 }
  0x25   : > { %s185_s28 = scalar_lea.sflag (!%p179_p11), [#allocation3], %s626_s22  ;;  %s188_s29 = scalar_lea.vmem (!%p179_p11), [#allocation2], %s340_s23 }
  0x29   : > { %487 = dma.done.wait (%p587_p8), %s185_s28, 32  }
  0x2a   : > { %489 = vsyncadd (%p587_p8), %s185_s28, 4294967264  ;;  %p214_p12 = scmp.lt.s32.totalorder %s508_s15, 1  ;;  %v222_v0 = vlaneseq  ;;  %v217_v3 = vld [vmem:[%s683_s1] sm:$0x1]  ;;  %s213_s24 = scalar_lea.vmem [#allocation5], %s340_s23 }
  0x2b   : > { %v220_v6 = vld [vmem:[%s188_s29] sm:$0x3]  ;;  %s244_s9 = sshll.u32 %s213_s24, 4  ;;  %s343_s10 = sshll.u32 %s508_s15, 5  ;;  %s245_s9 = int_to_ptr.vmem [resolvable:$true] %s244_s9 }
  0x2c   : > { %s215_s30 = scalar_select %p214_p12, %s508_s15, 1  ;;  %v223_v1 = vshrl.u32 %v222_v0, 7 }
  0x2d   : > { %s242_s19 = scalar_lea.hbm %s685_s3, %s343_s10  ;;  %s230_s21 = scalar_lea.sflag [#allocation4], %s626_s22 }
  0x2e   : > { %s216_s6 = scalar_lea.vmem %s684_s2, %s215_s30  ;;  %v224_v2 = vsub.s32 0, %v223_v1  ;;  %s436_s28 = scalar_lea.vmem %s245_s9, 32 }
  0x2f   : > { %v218_v4 = vld [vmem:[%s216_s6] sm:$0x1]  ;;  %p437_p8 = scmp.ne.s32.totalorder %s245_s9, %s436_s28  ;;  %s519_s30 = smov [#allocation5]  }
  0x30   : > { %v219_v5 = vadd.f32 %v218_v4, %v217_v3  ;;  %s440_s4 = sshll.u32 %s519_s30, 4  ;;  %s441_s4 = int_to_ptr.vmem [resolvable:$false] %s440_s4 }
  0x31   : > { %p438_p11 = pnand %p437_p8, %p591_p9  ;;  %s442_s23 = scalar_lea.vmem %s441_s4, 64 }
  0x32   : > { %v225_v7 = vrot.slane %v219_v5, %v224_v2  ;;  %p443_p1 = scmp.lt.s32.totalorder %s245_s9, %s441_s4  ;;  %p444_p2 = scmp.lt.s32.totalorder %s442_s23, %s436_s28 }
  0x33   : > { %p439_p0 = pneg %p438_p11 }
  0x34   : > { %v227_v8 = vmul.f32 %v225_v7, %v220_v6  ;;  %p445_p3 = por %p444_p2, %p443_p1 }
  0x36   : > { %228 = vst [vmem:[%s213_s24] sm:$0x3] %v227_v8  ;;  %p446_p5 = pnand %p445_p3, %p439_p0 }
  0x38   : > { %449 = shalt.err (!%p446_p5)
}
  0x39   : > { %s450_s15 = scalar_lea.hbm %s242_s19, 32  ;;  %s454_s5 = scalar_lea.hbm %s685_s3, 64 }
  0x3a   : > { %p451_p6 = scmp.ne.s32.totalorder %s242_s19, %s450_s15  ;;  %p455_p4 = scmp.lt.s32.totalorder %s242_s19, %s685_s3 }
  0x3b   : > { %p456_p13 = scmp.lt.s32.totalorder %s454_s5, %s450_s15 }
  0x3c   : > { %p452_p7 = pnand %p451_p6, %p591_p9 }
  0x3d   : > { %p457_p12 = por %p456_p13, %p455_p4 }
  0x3e   : > { %p453_p10 = pneg %p452_p7 }
  0x40   : > { %p458_p8 = pnand %p457_p12, %p453_p10 }
  0x42   : > { %461 = shalt.err (!%p458_p8)
}
  0x43   : > { %348 = dma.vmem_to_hbm [thread:$0]  (%p591_p9), %s245_s9, 32, %s242_s19, %s230_s21  }
  0x44 PF: > { %s256_s8 = sand.u32 1, %s496_s12   ;;  %p691_p11 = scmp.ne.s32.totalorder %s689_s27, 0 }
  0x45   : > { %p692_p0 = scmp.ge.s32.totalorder %s516_s17, 2  ;;  %s257_s24 = scalar_lea.sflag [#allocation4], %s256_s8 }
  0x47   : > { %p355_p1 = pnand %p692_p0, %p691_p11 }
  0x49   : > { %p356_p2 = pneg %p355_p1 }
  0x4b   : > { %491 = dma.done.wait (%p356_p2), %s257_s24, 32  }
  0x4c   : > { %493 = vsyncadd (%p356_p2), %s257_s24, 4294967264  ;;  %s19_s17 = sadd.s32 1, %s516_s17   ;;  %s693_s12 = smov %s500_s13 }
  0x4d   : > { %p16_p3 = scmp.ge.s32.totalorder %s19_s17, 4   ;;  %s694_s13 = smov %s504_s14 }
  0x4e   : > { %s695_s14 = smov %s596_s26  ;;  %s696_s15 = smov %s512_s16 }
  0x4f   : > { %s697_s16 = smov %s699_s20  ;;  %18 = sbr.rel (!%p16_p3) target bundleno = 6 (0x6), region = 80 }
  0x54   :  { %262 = vsyncpa [#allocation3], 1 }
  0x55   :  { %264 = vsyncpa [#allocation3 + $0x1], 1 }
  0x56   :  { %265 = vsyncpa [#allocation4], 1 }
  0x57   :  { %267 = vsyncpa [#allocation4 + $0x1], 1 }

</bundles_post_ra>
